<compile_context>
chip_gen: v7x
topology: tpu7x:2x2x1
jax: 0.10.0
libtpu: 0.0.40
codegen_flags: <defaults>
</compile_context>

<pallas_src>
import jax
import jax.numpy as jnp
from jax import lax
from jax.experimental import pallas as pl
from jax.experimental.pallas import tpu as pltpu


def _bn_row_param_kernel(x_ref, p_ref, o_ref):
    # x_ref: (TR, TC) data tile; p_ref: (TR, 2) packed [scale, shift]; o_ref: (TR, TC)
    x = x_ref[...].astype(jnp.float32)
    scale = p_ref[:, 0:1]
    shift = p_ref[:, 1:2]
    o_ref[...] = (x * scale + shift).astype(o_ref.dtype)


def _bn_col_param_kernel(x_ref, p_ref, o_ref):
    # x_ref: (TR, TC) data tile; p_ref: (2, TC) packed rows [scale; shift]; o_ref: (TR, TC)
    x = x_ref[...].astype(jnp.float32)
    scale = p_ref[0:1, :]
    shift = p_ref[1:2, :]
    o_ref[...] = (x * scale + shift).astype(o_ref.dtype)


_ROW_CAP = 512                  # sublane tile cap (multiple of 8)
_COL_CAP = 2048                 # lane tile cap (multiple of 128) -> <= 4 MiB f32 blocks
_TARGET_STEPS = 8               # keep both v7x TCs + the DMA double buffer fed
_MIN_BLOCK_BYTES = 512 * 1024   # don't shrink blocks below ~roofline-efficient size


def _choose_tiles(rows: int, cols: int, itemsize: int):
    """Near-max lane-dense tiles; shrink (legally) until the grid has enough steps."""
    tr = rows if rows <= _ROW_CAP else _ROW_CAP
    tc = cols if cols <= _COL_CAP else _COL_CAP

    def steps(a, b):
        return pl.cdiv(rows, a) * pl.cdiv(cols, b)

    while steps(tr, tc) < _TARGET_STEPS:
        # Halve only when the result stays (8,128)-legal and the block stays big.
        if tr % 16 == 0 and (tr // 2) * tc * itemsize >= _MIN_BLOCK_BYTES:
            tr //= 2
        elif tc % 256 == 0 and tr * (tc // 2) * itemsize >= _MIN_BLOCK_BYTES:
            tc //= 2
        else:
            break
    return tr, tc


def skip_branch_forward(x_nchw, gamma, beta, running_mean, running_var,
                        eps=1e-5, ignore=False):
    """Pallas implementation of SkipBranch.forward (inference-mode BatchNorm2d)."""
    if ignore:
        # TODO(synk): PyTorch returns the python scalar 0 here; a full-shape zero
        # array is the shape-safe JAX equivalent for downstream residual adds.
        return jnp.zeros_like(x_nchw)

    N, C, H, W = x_nchw.shape
    hw = H * W

    # Fold BN statistics once (frozen inference weights), in f32.
    scale = gamma.astype(jnp.float32) * lax.rsqrt(
        running_var.astype(jnp.float32) + jnp.float32(eps))
    shift = beta.astype(jnp.float32) - running_mean.astype(jnp.float32) * scale

    lane_dense = (hw % 128 == 0)
    if lane_dense:
        # Friendly spatial size: rows = N*C on sublanes, H*W on lanes; per-row params.
        rows, cols = N * C, hw
        x2d = x_nchw.reshape(rows, cols)                       # contiguous, free
        params = jnp.stack([jnp.tile(scale, N), jnp.tile(shift, N)], axis=-1)  # (rows, 2)
    else:
        # Awkward spatial size (7x7/14x14/28x28...): flatten channels+spatial onto the
        # lane axis so stores are (near-)full-width; per-column params, resident
        # across row tiles.
        rows, cols = N, C * hw
        x2d = x_nchw.reshape(rows, cols)                       # contiguous, free
        params = jnp.stack([jnp.repeat(scale, hw), jnp.repeat(shift, hw)], axis=0)  # (2, cols)

    itemsize = jnp.dtype(x2d.dtype).itemsize
    tr, tc = _choose_tiles(rows, cols, itemsize)
    grid = (pl.cdiv(rows, tr), pl.cdiv(cols, tc))

    if lane_dense:
        kernel = _bn_row_param_kernel
        param_spec = pl.BlockSpec((tr, 2), lambda i, j: (i, 0))   # constant along columns
    else:
        kernel = _bn_col_param_kernel
        param_spec = pl.BlockSpec((2, tc), lambda i, j: (0, j))   # constant along rows

    data_spec = pl.BlockSpec((tr, tc), lambda i, j: (i, j))

    out2d = pl.pallas_call(
        kernel,
        out_shape=jax.ShapeDtypeStruct((rows, cols), x2d.dtype),
        grid_spec=pltpu.PrefetchScalarGridSpec(
            num_scalar_prefetch=0,
            grid=grid,
            in_specs=[data_spec, param_spec],
            out_specs=data_spec,
        ),
        compiler_params=pltpu.CompilerParams(
            dimension_semantics=("parallel", "parallel"),
            # 4 MiB blocks x (2 in + 2 out buffers) + params ~= 17 MiB: exceeds the
            # v5e 16 MiB default scoped limit, so raise it explicitly; 48 MiB is
            # still comfortably inside v7x's 64 MiB physical VMEM.
            vmem_limit_bytes=48 * 1024 * 1024,
        ),
        cost_estimate=pl.CostEstimate(
            flops=2 * rows * cols,
            transcendentals=0,
            bytes_accessed=int(2 * rows * cols * itemsize + params.size * 4),
        ),
    )(x2d, params)

    return out2d.reshape(N, C, H, W)


def _reference(x, gamma, beta, mean, var, eps=1e-5):
    scale = gamma / jnp.sqrt(var + eps)
    shift = beta - mean * scale
    return x * scale[None, :, None, None] + shift[None, :, None, None]


def _make_bn_params(key, C):
    k_g, k_b, k_m, k_v = jax.random.split(key, 4)
    gamma = 1.0 + 0.1 * jax.random.normal(k_g, (C,), dtype=jnp.float32)
    beta = 0.1 * jax.random.normal(k_b, (C,), dtype=jnp.float32)
    running_mean = 0.05 * jax.random.normal(k_m, (C,), dtype=jnp.float32)
    running_var = 1.0 + 0.1 * jax.random.uniform(k_v, (C,), dtype=jnp.float32)
    return gamma, beta, running_mean, running_var


if __name__ == "__main__":
    key = jax.random.PRNGKey(0)

    # --- Test 1: lane-friendly shape (H*W % 128 == 0) -> per-row-param path ---
    N, C, H, W = 2, 4, 16, 16   # in_channels = out_channels = num_features = 4
    k_x, k_p, key = jax.random.split(key, 3)
    x = jax.random.normal(k_x, (N, C, H, W), dtype=jnp.float32)
    gamma, beta, rmean, rvar = _make_bn_params(k_p, C)

    y = jax.block_until_ready(skip_branch_forward(x, gamma, beta, rmean, rvar))
    y_ref = _reference(x, gamma, beta, rmean, rvar)
    assert y.shape == (N, C, H, W)
    assert jnp.allclose(y, y_ref, atol=1e-5, rtol=1e-5)

    # --- Test 2: awkward spatial size (14x14) -> per-column-param path ---
    N2, C2, H2, W2 = 2, 8, 14, 14
    k_x2, k_p2, key = jax.random.split(key, 3)
    x2 = jax.random.normal(k_x2, (N2, C2, H2, W2), dtype=jnp.float32)
    g2, b2, m2, v2 = _make_bn_params(k_p2, C2)
    y2 = jax.block_until_ready(skip_branch_forward(x2, g2, b2, m2, v2))
    assert jnp.allclose(y2, _reference(x2, g2, b2, m2, v2), atol=1e-5, rtol=1e-5)

    # --- Test 3: ragged cdiv grid (28x28, multiple column tiles + masked edge) ---
    N3, C3, H3, W3 = 2, 32, 28, 28
    k_x3, k_p3, key = jax.random.split(key, 3)
    x3 = jax.random.normal(k_x3, (N3, C3, H3, W3), dtype=jnp.float32)
    g3, b3, m3, v3 = _make_bn_params(k_p3, C3)
    y3 = jax.block_until_ready(skip_branch_forward(x3, g3, b3, m3, v3))
    assert jnp.allclose(y3, _reference(x3, g3, b3, m3, v3), atol=1e-5, rtol=1e-5)

    # --- ignore=True path (shape-safe zero) ---
    y0 = jax.block_until_ready(
        skip_branch_forward(x, gamma, beta, rmean, rvar, ignore=True))
    assert y0.shape == x.shape and jnp.all(y0 == 0)

    print("KERNEL_OK")
</pallas_src>

<mosaic_0001>
module attributes {stable_mosaic.version = 11 : i64} {
  func.func @_bn_row_param_kernel(%arg0: i32, %arg1: i32, %arg2: memref<8x256xf32, #tpu.memory_space<vmem>>, %arg3: memref<8x2xf32, #tpu.memory_space<vmem>>, %arg4: memref<8x256xf32, #tpu.memory_space<vmem>>) attributes {dimension_semantics = [#tpu.dimension_semantics<parallel>, #tpu.dimension_semantics<parallel>], iteration_bounds = array<i64: 1, 1>, scalar_prefetch = 0 : i64, scratch_operands = 0 : i64, tpu.core_type = #tpu.core_type<tc>, window_params = [{transform_indices = @transform_0, window_bounds = array<i64: 8, 256>}, {transform_indices = @transform_1, window_bounds = array<i64: 8, 2>}, {transform_indices = @transform_2, window_bounds = array<i64: 8, 256>}]} {
    %c0 = arith.constant 0 : index
    %c0_0 = arith.constant 0 : index
    %0 = vector.load %arg2[%c0, %c0_0] : memref<8x256xf32, #tpu.memory_space<vmem>>, vector<8x256xf32>
    %c0_1 = arith.constant 0 : index
    %c0_2 = arith.constant 0 : index
    %1 = vector.load %arg3[%c0_1, %c0_2] : memref<8x2xf32, #tpu.memory_space<vmem>>, vector<8x1xf32>
    %c0_3 = arith.constant 0 : index
    %c1 = arith.constant 1 : index
    %2 = vector.load %arg3[%c0_3, %c1] : memref<8x2xf32, #tpu.memory_space<vmem>>, vector<8x1xf32>
    %3 = vector.broadcast %1 : vector<8x1xf32> to vector<8x256xf32>
    %4 = arith.mulf %0, %3 : vector<8x256xf32>
    %5 = vector.broadcast %2 : vector<8x1xf32> to vector<8x256xf32>
    %6 = arith.addf %4, %5 : vector<8x256xf32>
    %c0_4 = arith.constant 0 : index
    %c0_5 = arith.constant 0 : index
    %7 = vector.load %arg4[%c0_4, %c0_5] : memref<8x256xf32, #tpu.memory_space<vmem>>, vector<8x256xf32>
    tpu.vector_store %arg4[%c0_4, %c0_5], %6 {strides = array<i32>} : memref<8x256xf32, #tpu.memory_space<vmem>>, vector<8x256xf32>,
    return
  }
  func.func @transform_0(%arg0: i32, %arg1: i32) -> (i32, i32) {
    %c0_i32 = arith.constant 0 : i32
    return %arg0, %arg1 : i32, i32
  }
  func.func @transform_1(%arg0: i32, %arg1: i32) -> (i32, i32) {
    %c0_i32 = arith.constant 0 : i32
    %c0_i32_0 = arith.constant 0 : i32
    return %arg0, %c0_i32 : i32, i32
  }
  func.func @transform_2(%arg0: i32, %arg1: i32) -> (i32, i32) {
    %c0_i32 = arith.constant 0 : i32
    return %arg0, %arg1 : i32, i32
  }
}

</mosaic_0001>

<bundles_post_ra>
// kernel: tpu_custom_call.1
= control target key start
LH: loop header
LB: loop body
LE: loop exit
PB: predicated region body
PF: predicated region fallthrough
CT: control target
= control target key end

     0   :  { %7 = vsyncpa [#allocation3], 0  ;;  %s157_s0 = inlined_call_operand.hbm [shape: f32[8,256], index: 0, kind: input, shape index: {}]   ;;  %s158_s1 = inlined_call_operand.vmem [shape: f32[8,2], index: 1, kind: input, shape index: {}]   ;;  %s159_s2 = inlined_call_operand.hbm [shape: f32[8,256], index: 2, kind: output, shape index: {}]  }
   0x1   :  { %8 = vsyncpa [#allocation4], 0  ;;  %s111_s9 = smov [#allocation2]   ;;  %s63_s13 = scalar_lea.hbm %s157_s0, 256 }
   0x2   :  { %s15_s10 = sshll.u32 %s111_s9, 4  ;;  %p64_p0 = scmp.ne.s32.totalorder %s157_s0, %s63_s13  ;;  %s16_s10 = int_to_ptr.vmem [resolvable:$true] %s15_s10 }
   0x3   :  { %p67_p1 = scmp.lt.u32.totalorder %s63_s13, %s157_s0 }
   0x5   :  { %p69_p2 = pnand %p67_p1, %p64_p0 }
   0x7   :  { %72 = shalt.err (!%p69_p2)
}
   0x8   :  { %s73_s18 = scalar_lea.vmem %s16_s10, 256  ;;  %p78_p4 = scmp.lt.s32.totalorder %s16_s10, %s16_s10 }
   0x9   :  { %p74_p3 = scmp.ne.s32.totalorder %s16_s10, %s73_s18  ;;  %p79_p5 = scmp.lt.s32.totalorder %s73_s18, %s73_s18 }
   0xb   :  { %p80_p6 = por %p79_p5, %p78_p4 }
   0xd   :  { %p81_p7 = pnand %p80_p6, %p74_p3 }
   0xf   :  { %84 = shalt.err (!%p81_p7)
}
  0x10   :  { %18 = dma.hbm_to_vmem [thread:$0]  %s157_s0, 256, %s16_s10, [#allocation3]  }
  0x11   :  { %107 = dma.done.wait [#allocation3], 256  }
  0x12   :  { %108 = vsyncadd [#allocation3], 4294967040  ;;  %v112_v0 = vmov 0   ;;  %v26_v1 = vld [vmem:[%s158_s1] sm:$0xff]  ;;  %v113_v2 = vmov 1   ;;  %v25_v5 = vld [vmem:[#allocation2 + $0x8] sm:$0xff] }
  0x13   :  { %61 = vset.pattern.permute.xlu0 %v112_v0  ;;  %v24_v4 = vld [vmem:[#allocation2] sm:$0xff]  ;;  %s114_s23 = smov [#allocation5]  }
  0x14   :  { %29 = vperm.xlu0 %61, %v26_v1   ;;  %s48_s24 = sshll.u32 %s114_s23, 4  ;;  %s49_s24 = int_to_ptr.vmem [resolvable:$true] %s48_s24 }
  0x15   :  { %s85_s0 = scalar_lea.vmem %s49_s24, 256  ;;  %p90_p9 = scmp.lt.s32.totalorder %s49_s24, %s49_s24 }
  0x16   :  { %p86_p8 = scmp.ne.s32.totalorder %s49_s24, %s85_s0  ;;  %p91_p10 = scmp.lt.s32.totalorder %s85_s0, %s85_s0 }
  0x18   :  { %62 = vset.pattern.permute.xlu0 %v113_v2  ;;  %p92_p11 = por %p91_p10, %p90_p9 }
  0x19   :  { %35 = vperm.xlu0 %62, %v26_v1  }
  0x1a   :  { %p93_p12 = pnand %p92_p11, %p86_p8 }
  0x93   :  { %v30_v3 = vpop.permute.xlu0 %29 }
  0x94   :  { %v32_v6 = vmul.f32 %v30_v3, %v24_v4  ;;  %v33_v7 = vmul.f32 %v30_v3, %v25_v5 }
  0x98   :  { %v36_v8 = vpop.permute.xlu0 %35 }
  0x99   :  { %v38_v9 = vadd.f32 %v36_v8, %v32_v6  ;;  %v39_v10 = vadd.f32 %v36_v8, %v33_v7 }
  0x9b   :  { %40 = vst [vmem:[#allocation5] sm:$0xff] %v38_v9  ;;  %41 = vst [vmem:[#allocation5 + $0x8] sm:$0xff] %v39_v10 }
  0x9c   :  { %96 = shalt.err (!%p93_p12)
}
  0x9d   :  { %s97_s26 = scalar_lea.hbm %s159_s2, 256 }
  0x9e   :  { %p98_p13 = scmp.ne.s32.totalorder %s159_s2, %s97_s26  ;;  %p101_p0 = scmp.lt.u32.totalorder %s97_s26, %s159_s2 }
  0xa0   :  { %p103_p1 = pnand %p101_p0, %p98_p13 }
  0xa2   :  { %106 = shalt.err (!%p103_p1)
}
  0xa3   :  { %51 = dma.vmem_to_hbm [thread:$0]  %s49_s24, 256, %s159_s2, [#allocation4]  }
  0xa4   :  { %109 = dma.done.wait [#allocation4], 256  }
  0xa5   :  { %110 = vsyncadd [#allocation4], 4294967040 }
  0xa6   :  { %55 = vsyncpa [#allocation3], 1 }
  0xa7   :  { %56 = vsyncpa [#allocation4], 1 }

</bundles_post_ra>
